<compile_context>
chip_gen: v7x
topology: tpu7x:2x2x1
jax: 0.10.0
libtpu: 0.0.40
codegen_flags: <defaults>
</compile_context>

<pallas_src>
import jax
import jax.numpy as jnp
from jax.experimental import pallas as pl
from jax.experimental.pallas import tpu as pltpu


def _ceil_to(x, m):
    return ((x + m - 1) // m) * m


# ---------------------------------------------------------------------------
# Kernel
# ---------------------------------------------------------------------------
def _cls_head_kernel(x_ref, w1_ref, s1_ref, w2_ref, b2_ref, o_ref):
    # x_ref:  (TB, F)      bf16   (dropout in eval mode == identity)
    # w1_ref: (F, H)       bf16   = W1^T * bn_scale   (BatchNorm folded in)
    # s1_ref: (1, H)       f32    = b1*bn_scale + bn_shift
    # w2_ref: (H, C_pad)   bf16   = W2^T, class dim padded to 128-lane multiple
    # b2_ref: (1, C_pad)   f32
    # o_ref:  (TB, C_pad)  f32    lane-dense (unmasked) output tile

    # dense1 (+ folded BN eval affine + bias) + ReLU, f32 accumulation.
    h = jnp.dot(x_ref[...], w1_ref[...], preferred_element_type=jnp.float32)
    h = jnp.maximum(h + s1_ref[...], 0.0)

    # out_proj: cast h to bf16 (halves the inter-matmul VMEM live range,
    # single-pass MXU on v6e/v7x), accumulate in f32, add bias.
    acc = jnp.dot(h.astype(w2_ref.dtype), w2_ref[...],
                  preferred_element_type=jnp.float32)
    o_ref[...] = (acc + b2_ref[...]).astype(o_ref.dtype)


# ---------------------------------------------------------------------------
# One-time parameter prep (hoisted out of the per-call path)
# ---------------------------------------------------------------------------
def prepare_classification_head_params(w1, b1, gamma, beta, running_mean,
                                        running_var, w2, b2, *, eps=1e-5,
                                        param_dtype=jnp.bfloat16):
    """Fold BN(eval)+bias into the weights, transpose, pad, cast. Call once.

    w1: (H, F)  b1: (H,)   -- torch nn.Linear layout, H=1024
    gamma/beta/running_mean/running_var: (H,) -- BatchNorm1d buffers
    w2: (C, H)  b2: (C,)
    """
    H, F = w1.shape
    C = w2.shape[0]
    C_pad = _ceil_to(max(C, 1), 128)

    inv_std = jax.lax.rsqrt(running_var.astype(jnp.float32) + eps)
    scale = gamma.astype(jnp.float32) * inv_std                       # (H,)
    shift = beta.astype(jnp.float32) - running_mean.astype(jnp.float32) * scale

    # relu((x@W1^T + b1)*scale + shift) == relu(x@(W1^T*scale) + (b1*scale+shift))
    w1_f = w1.T.astype(jnp.float32) * scale[None, :]                  # (F, H)
    s1 = (b1.astype(jnp.float32) * scale + shift).reshape(1, H)       # (1, H)

    w2_p = jnp.zeros((H, C_pad), jnp.float32).at[:, :C].set(
        w2.T.astype(jnp.float32))                                     # (H, C_pad)
    b2_p = jnp.zeros((1, C_pad), jnp.float32).at[:, :C].set(
        b2.reshape(1, C).astype(jnp.float32))                         # (1, C_pad)

    return {
        "w1": w1_f.astype(param_dtype),   # (F, H)      bf16
        "s1": s1,                         # (1, H)      f32
        "w2": w2_p.astype(param_dtype),   # (H, C_pad)  bf16
        "b2": b2_p,                       # (1, C_pad)  f32
        "num_classes": C,
    }


# ---------------------------------------------------------------------------
# Forward
# ---------------------------------------------------------------------------
def _resident_spec(shape, single_buffer):
    """BlockSpec for an operand that stays resident across all grid steps."""
    index_map = lambda i: (0,) * len(shape)
    if single_buffer:
        # Constant index_map => double-buffering it is pure VMEM waste.
        return pl.BlockSpec(shape, index_map, pipeline_mode=pl.Buffered(1))
    return pl.BlockSpec(shape, index_map)


def classification_head_forward(features, params, *, block_b=256):
    """Fused ClassificationHead forward (eval mode).

    features: list/tuple of (B, f_i) arrays (concatenated along -1) or a
              single (B, F) array with F == out_size.
    params:   dict from prepare_classification_head_params().
    returns:  (B, num_classes) float32
    """
    if isinstance(features, (list, tuple)):
        x = jnp.concatenate(features, axis=-1)
    else:
        x = features

    w1, s1, w2, b2 = params["w1"], params["s1"], params["w2"], params["b2"]
    C = params["num_classes"]
    F, H = w1.shape
    C_pad = w2.shape[1]

    B = x.shape[0]
    x = x.astype(w1.dtype)                 # bf16 stream (halves x DMA bytes)

    # --- batch tiling -------------------------------------------------------
    #  * rows tiled to a multiple of 8 (sublane)
    #  * >=2 grid steps whenever B >= 16 so "parallel" shards across both v7x
    #    TensorCores (no-op on v5e/v6e)
    #  * tile size divides ceil(B,8) tightly (row-padding waste <= 7 rows)
    B8 = _ceil_to(B, 8)
    n_tiles = max(pl.cdiv(B8, block_b), 2 if B8 >= 16 else 1)
    TB = _ceil_to(pl.cdiv(B8, n_tiles), 8)
    B_pad = TB * n_tiles
    if B_pad != B:
        x = jnp.pad(x, ((0, B_pad - B), (0, 0)))

    # --- explicit VMEM budget (v5e scoped default is only 16 MiB) -----------
    bw = jnp.dtype(w1.dtype).itemsize      # bf16 -> 2
    bf = 4                                 # f32
    vmem_bytes = (
        2 * TB * F * bw                    # x tile (double-buffered)
        + 2 * TB * C_pad * bf              # out tile (double-buffered)
        + (F * H + H * C_pad) * bw         # resident W1', W2' (single-buffered)
        + (H + C_pad) * bf                 # resident s1, b2
        + TB * H * (bf + bw)               # h in f32 + bf16
        + TB * C_pad * bf                  # second-matmul accumulator
    )
    vmem_limit = int(min(max(2 * vmem_bytes + (4 << 20), 16 << 20), 48 << 20))

    def run(single_buffer_weights):
        return pl.pallas_call(
            _cls_head_kernel,
            out_shape=jax.ShapeDtypeStruct((B_pad, C_pad), jnp.float32),
            grid_spec=pl.GridSpec(
                grid=(n_tiles,),
                in_specs=[
                    pl.BlockSpec((TB, F), lambda i: (i, 0)),   # x (pipelined)
                    _resident_spec((F, H), single_buffer_weights),      # W1'
                    _resident_spec((1, H), single_buffer_weights),      # shift'
                    _resident_spec((H, C_pad), single_buffer_weights),  # W2'
                    _resident_spec((1, C_pad), single_buffer_weights),  # b2
                ],
                out_specs=pl.BlockSpec((TB, C_pad), lambda i: (i, 0)),
            ),
            compiler_params=pltpu.CompilerParams(
                dimension_semantics=("parallel",),   # batch tiles -> both TCs
                vmem_limit_bytes=vmem_limit,
            ),
        )(x, w1, s1, w2, b2)

    try:
        out = run(single_buffer_weights=True)
    except Exception:
        # Fallback for Pallas builds without BlockSpec pipeline_mode support.
        out = run(single_buffer_weights=False)

    return out[:B, :C]


# ---------------------------------------------------------------------------
# Reference (pure JAX, f32) and demo
# ---------------------------------------------------------------------------
def _reference(x, w1, b1, gamma, beta, mean, var, w2, b2, eps=1e-5):
    h = x @ w1.T + b1
    h = (h - mean) * jax.lax.rsqrt(var + eps) * gamma + beta
    h = jnp.maximum(h, 0.0)
    return h @ w2.T + b2


if __name__ == "__main__":
    # ClassificationHead(out_size=32, num_classes=82), eval mode.
    out_size = 32
    hidden = 1024
    num_classes = 82
    batch = 8

    key = jax.random.PRNGKey(0)
    (k_f1, k_f2, k_w1, k_b1, k_g, k_be, k_m, k_v, k_w2, k_b2) = \
        jax.random.split(key, 10)

    # forward() does torch.cat(features, -1): pass a list of feature chunks.
    feats = [
        jax.random.normal(k_f1, (batch, out_size // 2), dtype=jnp.float32),
        jax.random.normal(k_f2, (batch, out_size // 2), dtype=jnp.float32),
    ]

    # nn.Linear-style uniform init (bound = 1/sqrt(fan_in)).
    bound1 = 1.0 / (out_size ** 0.5)
    w1 = jax.random.uniform(k_w1, (hidden, out_size), minval=-bound1,
                            maxval=bound1, dtype=jnp.float32)
    b1 = jax.random.uniform(k_b1, (hidden,), minval=-bound1,
                            maxval=bound1, dtype=jnp.float32)

    # BatchNorm1d(1024) buffers (eval-mode running stats).
    gamma = 1.0 + 0.1 * jax.random.normal(k_g, (hidden,), dtype=jnp.float32)
    beta = 0.1 * jax.random.normal(k_be, (hidden,), dtype=jnp.float32)
    running_mean = 0.1 * jax.random.normal(k_m, (hidden,), dtype=jnp.float32)
    running_var = jax.random.uniform(k_v, (hidden,), minval=0.5, maxval=1.5,
                                     dtype=jnp.float32)

    bound2 = 1.0 / (hidden ** 0.5)
    w2 = jax.random.uniform(k_w2, (num_classes, hidden), minval=-bound2,
                            maxval=bound2, dtype=jnp.float32)
    b2 = jax.random.uniform(k_b2, (num_classes,), minval=-bound2,
                            maxval=bound2, dtype=jnp.float32)

    # One-time weight prep (in production: do at checkpoint load, then reuse).
    params = prepare_classification_head_params(
        w1, b1, gamma, beta, running_mean, running_var, w2, b2)

    out = classification_head_forward(feats, params)
    jax.block_until_ready(out)

    # f32 reference; bf16 streaming => slightly looser tolerance.
    x_cat = jnp.concatenate(feats, axis=-1)
    ref = _reference(x_cat, w1, b1, gamma, beta, running_mean, running_var,
                     w2, b2)

    assert out.shape == (batch, num_classes)
    max_err = float(jnp.max(jnp.abs(out - ref)))
    assert jnp.allclose(out, ref, atol=2e-2, rtol=2e-2), max_err

    print("KERNEL_OK")
</pallas_src>

<mosaic_0001>
module attributes {stable_mosaic.version = 11 : i64} {
  func.func @_cls_head_kernel(%arg0: i32, %arg1: memref<8x32xbf16, #tpu.memory_space<vmem>>, %arg2: memref<32x1024xbf16, #tpu.memory_space<vmem>>, %arg3: memref<1x1024xf32, #tpu.memory_space<vmem>>, %arg4: memref<1024x128xbf16, #tpu.memory_space<vmem>>, %arg5: memref<1x128xf32, #tpu.memory_space<vmem>>, %arg6: memref<8x128xf32, #tpu.memory_space<vmem>>) attributes {dimension_semantics = [#tpu.dimension_semantics<parallel>], iteration_bounds = array<i64: 1>, scalar_prefetch = 0 : i64, scratch_operands = 0 : i64, tpu.core_type = #tpu.core_type<tc>, window_params = [{transform_indices = @transform_0, window_bounds = array<i64: 8, 32>}, {pipeline_mode = #tpu.pipeline_mode<synchronous>, transform_indices = @transform_1, window_bounds = array<i64: 32, 1024>}, {pipeline_mode = #tpu.pipeline_mode<synchronous>, transform_indices = @transform_2, window_bounds = array<i64: 1, 1024>}, {pipeline_mode = #tpu.pipeline_mode<synchronous>, transform_indices = @transform_3, window_bounds = array<i64: 1024, 128>}, {pipeline_mode = #tpu.pipeline_mode<synchronous>, transform_indices = @transform_4, window_bounds = array<i64: 1, 128>}, {transform_indices = @transform_5, window_bounds = array<i64: 8, 128>}]} {
    %c0 = arith.constant 0 : index
    %c0_0 = arith.constant 0 : index
    %0 = vector.load %arg1[%c0, %c0_0] : memref<8x32xbf16, #tpu.memory_space<vmem>>, vector<8x32xbf16>
    %c0_1 = arith.constant 0 : index
    %c0_2 = arith.constant 0 : index
    %1 = vector.load %arg2[%c0_1, %c0_2] : memref<32x1024xbf16, #tpu.memory_space<vmem>>, vector<32x1024xbf16>
    %cst = arith.constant dense<0.000000e+00> : vector<8x1024xf32>
    %2 = tpu.matmul %0, %1, %cst {dimension_numbers = #tpu.dot_dimension_numbers<[1], [0], [0], [1], [0, 0, 1, 1], [], []>} : vector<8x32xbf16>, vector<32x1024xbf16>, vector<8x1024xf32> -> vector<8x1024xf32>
    %c0_3 = arith.constant 0 : index
    %c0_4 = arith.constant 0 : index
    %3 = vector.load %arg3[%c0_3, %c0_4] : memref<1x1024xf32, #tpu.memory_space<vmem>>, vector<1x1024xf32>
    %4 = vector.broadcast %3 : vector<1x1024xf32> to vector<8x1024xf32>
    %5 = arith.addf %2, %4 : vector<8x1024xf32>
    %cst_5 = arith.constant 0.000000e+00 : f32
    %6 = vector.broadcast %cst_5 : f32 to vector<8x1024xf32>
    %7 = arith.maximumf %5, %6 : vector<8x1024xf32>
    %8 = arith.truncf %7 : vector<8x1024xf32> to vector<8x1024xbf16>
    %c0_6 = arith.constant 0 : index
    %c0_7 = arith.constant 0 : index
    %9 = vector.load %arg4[%c0_6, %c0_7] : memref<1024x128xbf16, #tpu.memory_space<vmem>>, vector<1024x128xbf16>
    %cst_8 = arith.constant dense<0.000000e+00> : vector<8x128xf32>
    %10 = tpu.matmul %8, %9, %cst_8 {dimension_numbers = #tpu.dot_dimension_numbers<[1], [0], [0], [1], [0, 0, 1, 1], [], []>} : vector<8x1024xbf16>, vector<1024x128xbf16>, vector<8x128xf32> -> vector<8x128xf32>
    %c0_9 = arith.constant 0 : index
    %c0_10 = arith.constant 0 : index
    %11 = vector.load %arg5[%c0_9, %c0_10] : memref<1x128xf32, #tpu.memory_space<vmem>>, vector<1x128xf32>
    %12 = vector.broadcast %11 : vector<1x128xf32> to vector<8x128xf32>
    %13 = arith.addf %10, %12 : vector<8x128xf32>
    %c0_11 = arith.constant 0 : index
    %c0_12 = arith.constant 0 : index
    %14 = vector.load %arg6[%c0_11, %c0_12] : memref<8x128xf32, #tpu.memory_space<vmem>>, vector<8x128xf32>
    tpu.vector_store %arg6[%c0_11, %c0_12], %13 {strides = array<i32>} : memref<8x128xf32, #tpu.memory_space<vmem>>, vector<8x128xf32>,
    return
  }
  func.func @transform_0(%arg0: i32) -> (i32, i32) {
    %c0_i32 = arith.constant 0 : i32
    %c0_i32_0 = arith.constant 0 : i32
    return %arg0, %c0_i32 : i32, i32
  }
  func.func @transform_1(%arg0: i32) -> (i32, i32) {
    %c0_i32 = arith.constant 0 : i32
    %c0_i32_0 = arith.constant 0 : i32
    %c0_i32_1 = arith.constant 0 : i32
    return %c0_i32, %c0_i32_0 : i32, i32
  }
  func.func @transform_2(%arg0: i32) -> (i32, i32) {
    %c0_i32 = arith.constant 0 : i32
    %c0_i32_0 = arith.constant 0 : i32
    %c0_i32_1 = arith.constant 0 : i32
    return %c0_i32, %c0_i32_0 : i32, i32
  }
  func.func @transform_3(%arg0: i32) -> (i32, i32) {
    %c0_i32 = arith.constant 0 : i32
    %c0_i32_0 = arith.constant 0 : i32
    %c0_i32_1 = arith.constant 0 : i32
    return %c0_i32, %c0_i32_0 : i32, i32
  }
  func.func @transform_4(%arg0: i32) -> (i32, i32) {
    %c0_i32 = arith.constant 0 : i32
    %c0_i32_0 = arith.constant 0 : i32
    %c0_i32_1 = arith.constant 0 : i32
    return %c0_i32, %c0_i32_0 : i32, i32
  }
  func.func @transform_5(%arg0: i32) -> (i32, i32) {
    %c0_i32 = arith.constant 0 : i32
    %c0_i32_0 = arith.constant 0 : i32
    return %arg0, %c0_i32 : i32, i32
  }
}

module attributes {stable_mosaic.version = 11 : i64} {
  func.func @_cls_head_kernel(%arg0: i32, %arg1: memref<8x32xbf16, #tpu.memory_space<vmem>>, %arg2: memref<32x1024xbf16, #tpu.memory_space<vmem>>, %arg3: memref<1x1024xf32, #tpu.memory_space<vmem>>, %arg4: memref<1024x128xbf16, #tpu.memory_space<vmem>>, %arg5: memref<1x128xf32, #tpu.memory_space<vmem>>, %arg6: memref<8x128xf32, #tpu.memory_space<vmem>>) attributes {dimension_semantics = [#tpu.dimension_semantics<parallel>], iteration_bounds = array<i64: 1>, scalar_prefetch = 0 : i64, scratch_operands = 0 : i64, tpu.core_type = #tpu.core_type<tc>, window_params = [{transform_indices = @transform_0, window_bounds = array<i64: 8, 32>}, {pipeline_mode = #tpu.pipeline_mode<synchronous>, transform_indices = @transform_1, window_bounds = array<i64: 32, 1024>}, {pipeline_mode = #tpu.pipeline_mode<synchronous>, transform_indices = @transform_2, window_bounds = array<i64: 1, 1024>}, {pipeline_mode = #tpu.pipeline_mode<synchronous>, transform_indices = @transform_3, window_bounds = array<i64: 1024, 128>}, {pipeline_mode = #tpu.pipeline_mode<synchronous>, transform_indices = @transform_4, window_bounds = array<i64: 1, 128>}, {transform_indices = @transform_5, window_bounds = array<i64: 8, 128>}]} {
    %c0 = arith.constant 0 : index
    %c0_0 = arith.constant 0 : index
    %0 = vector.load %arg1[%c0, %c0_0] : memref<8x32xbf16, #tpu.memory_space<vmem>>, vector<8x32xbf16>
    %c0_1 = arith.constant 0 : index
    %c0_2 = arith.constant 0 : index
    %1 = vector.load %arg2[%c0_1, %c0_2] : memref<32x1024xbf16, #tpu.memory_space<vmem>>, vector<32x1024xbf16>
    %cst = arith.constant dense<0.000000e+00> : vector<8x1024xf32>
    %2 = tpu.matmul %0, %1, %cst {dimension_numbers = #tpu.dot_dimension_numbers<[1], [0], [0], [1], [0, 0, 1, 1], [], []>} : vector<8x32xbf16>, vector<32x1024xbf16>, vector<8x1024xf32> -> vector<8x1024xf32>
    %c0_3 = arith.constant 0 : index
    %c0_4 = arith.constant 0 : index
    %3 = vector.load %arg3[%c0_3, %c0_4] : memref<1x1024xf32, #tpu.memory_space<vmem>>, vector<1x1024xf32>
    %4 = vector.broadcast %3 : vector<1x1024xf32> to vector<8x1024xf32>
    %5 = arith.addf %2, %4 : vector<8x1024xf32>
    %cst_5 = arith.constant 0.000000e+00 : f32
    %6 = vector.broadcast %cst_5 : f32 to vector<8x1024xf32>
    %7 = arith.maximumf %5, %6 : vector<8x1024xf32>
    %8 = arith.truncf %7 : vector<8x1024xf32> to vector<8x1024xbf16>
    %c0_6 = arith.constant 0 : index
    %c0_7 = arith.constant 0 : index
    %9 = vector.load %arg4[%c0_6, %c0_7] : memref<1024x128xbf16, #tpu.memory_space<vmem>>, vector<1024x128xbf16>
    %cst_8 = arith.constant dense<0.000000e+00> : vector<8x128xf32>
    %10 = tpu.matmul %8, %9, %cst_8 {dimension_numbers = #tpu.dot_dimension_numbers<[1], [0], [0], [1], [0, 0, 1, 1], [], []>} : vector<8x1024xbf16>, vector<1024x128xbf16>, vector<8x128xf32> -> vector<8x128xf32>
    %c0_9 = arith.constant 0 : index
    %c0_10 = arith.constant 0 : index
    %11 = vector.load %arg5[%c0_9, %c0_10] : memref<1x128xf32, #tpu.memory_space<vmem>>, vector<1x128xf32>
    %12 = vector.broadcast %11 : vector<1x128xf32> to vector<8x128xf32>
    %13 = arith.addf %10, %12 : vector<8x128xf32>
    %c0_11 = arith.constant 0 : index
    %c0_12 = arith.constant 0 : index
    %14 = vector.load %arg6[%c0_11, %c0_12] : memref<8x128xf32, #tpu.memory_space<vmem>>, vector<8x128xf32>
    tpu.vector_store %arg6[%c0_11, %c0_12], %13 {strides = array<i32>} : memref<8x128xf32, #tpu.memory_space<vmem>>, vector<8x128xf32>,
    return
  }
  func.func @transform_0(%arg0: i32) -> (i32, i32) {
    %c0_i32 = arith.constant 0 : i32
    %c0_i32_0 = arith.constant 0 : i32
    return %arg0, %c0_i32 : i32, i32
  }
  func.func @transform_1(%arg0: i32) -> (i32, i32) {
    %c0_i32 = arith.constant 0 : i32
    %c0_i32_0 = arith.constant 0 : i32
    %c0_i32_1 = arith.constant 0 : i32
    return %c0_i32, %c0_i32_0 : i32, i32
  }
  func.func @transform_2(%arg0: i32) -> (i32, i32) {
    %c0_i32 = arith.constant 0 : i32
    %c0_i32_0 = arith.constant 0 : i32
    %c0_i32_1 = arith.constant 0 : i32
    return %c0_i32, %c0_i32_0 : i32, i32
  }
  func.func @transform_3(%arg0: i32) -> (i32, i32) {
    %c0_i32 = arith.constant 0 : i32
    %c0_i32_0 = arith.constant 0 : i32
    %c0_i32_1 = arith.constant 0 : i32
    return %c0_i32, %c0_i32_0 : i32, i32
  }
  func.func @transform_4(%arg0: i32) -> (i32, i32) {
    %c0_i32 = arith.constant 0 : i32
    %c0_i32_0 = arith.constant 0 : i32
    %c0_i32_1 = arith.constant 0 : i32
    return %c0_i32, %c0_i32_0 : i32, i32
  }
  func.func @transform_5(%arg0: i32) -> (i32, i32) {
    %c0_i32 = arith.constant 0 : i32
    %c0_i32_0 = arith.constant 0 : i32
    return %arg0, %c0_i32 : i32, i32
  }
}

</mosaic_0001>

<bundles_post_ra>
// kernel: tpu_custom_call.1
= control target key start
LH: loop header
LB: loop body
LE: loop exit
PB: predicated region body
PF: predicated region fallthrough
CT: control target
= control target key end

     0   :  { %10 = vsyncpa [#allocation3], 0  ;;  %s1588_s0 = inlined_call_operand.hbm [shape: bf16[8,32], index: 0, kind: input, shape index: {}]   ;;  %s1589_s1 = inlined_call_operand.hbm [shape: bf16[32,1024], index: 1, kind: input, shape index: {}]   ;;  %s1590_s2 = inlined_call_operand.hbm [shape: f32[1,1024], index: 2, kind: input, shape index: {}]   ;;  %s1591_s3 = inlined_call_operand.hbm [shape: bf16[1024,128], index: 3, kind: input, shape index: {}]   ;;  %s1592_s4 = inlined_call_operand.vmem [shape: f32[1,128], index: 4, kind: input, shape index: {}]   ;;  %s1593_s5 = inlined_call_operand.hbm [shape: f32[8,128], index: 5, kind: output, shape index: {}]  }
   0x1   :  { %11 = vsyncpa [#allocation6], 0 }
   0x2   :  { %12 = vsyncpa [#allocation9], 0 }
   0x3   :  { %13 = vsyncpa [#allocation4], 0  ;;  %s1458_s18 = smov [#allocation5]   ;;  %s1340_s22 = scalar_lea.hbm %s1589_s1, 2048 }
   0x4   :  { %s29_s19 = sshll.u32 %s1458_s18, 4  ;;  %p1341_p0 = scmp.ne.s32.totalorder %s1589_s1, %s1340_s22  ;;  %s30_s19 = int_to_ptr.vmem [resolvable:$true] %s29_s19 }
   0x5   :  { %p1344_p1 = scmp.lt.u32.totalorder %s1340_s22, %s1589_s1 }
   0x7   :  { %p1346_p2 = pnand %p1344_p1, %p1341_p0 }
   0x9   :  { %1349 = shalt.err (!%p1346_p2)
}
   0xa   :  { %s1350_s27 = scalar_lea.vmem %s30_s19, 2048  ;;  %p1355_p4 = scmp.lt.s32.totalorder %s30_s19, %s30_s19 }
   0xb   :  { %p1351_p3 = scmp.ne.s32.totalorder %s30_s19, %s1350_s27  ;;  %p1356_p5 = scmp.lt.s32.totalorder %s1350_s27, %s1350_s27 }
   0xd   :  { %p1357_p6 = por %p1356_p5, %p1355_p4 }
   0xf   :  { %p1358_p7 = pnand %p1357_p6, %p1351_p3 }
  0x11   :  { %1361 = shalt.err (!%p1358_p7)
}
  0x12   :  { %s1459_s28 = smov 512   ;;  %s1460_s29 = smov 32  }
  0x13   :  { %35 = dma.hbm_to_vmem [thread:$0]  %s1589_s1, 2048, %s30_s19, [#allocation6], %s1459_s28, %s1459_s28, %s1460_s29  }
  0x14   :  { %s1461_s7 = smov [#allocation2]   ;;  %s1462_s9 = smov [#allocation7]  }
  0x15   :  { %s20_s8 = sshll.u32 %s1461_s7, 4  ;;  %s42_s10 = sshll.u32 %s1462_s9, 4  ;;  %s21_s8 = int_to_ptr.vmem [resolvable:$true] %s20_s8  ;;  %s43_s10 = int_to_ptr.vmem [resolvable:$true] %s42_s10 }
  0x16   :  { %s1362_s13 = scalar_lea.hbm %s1588_s0, 64 }
  0x17   :  { %p1363_p8 = scmp.ne.s32.totalorder %s1588_s0, %s1362_s13  ;;  %p1366_p9 = scmp.lt.u32.totalorder %s1362_s13, %s1588_s0 }
  0x19   :  { %p1368_p10 = pnand %p1366_p9, %p1363_p8 }
  0x1b   :  { %1371 = shalt.err (!%p1368_p10)
}
  0x1c   :  { %s1372_s1 = scalar_lea.vmem %s21_s8, 64  ;;  %p1377_p12 = scmp.lt.s32.totalorder %s21_s8, %s21_s8 }
  0x1d   :  { %p1373_p11 = scmp.ne.s32.totalorder %s21_s8, %s1372_s1  ;;  %p1378_p13 = scmp.lt.s32.totalorder %s1372_s1, %s1372_s1 }
  0x1f   :  { %p1379_p0 = por %p1378_p13, %p1377_p12 }
  0x21   :  { %p1380_p1 = pnand %p1379_p0, %p1373_p11 }
  0x23   :  { %1383 = shalt.err (!%p1380_p1)
}
  0x24   :  { %23 = dma.hbm_to_vmem [thread:$0]  %s1588_s0, 64, %s21_s8, [#allocation3]  }
  0x25   :  { %s1384_s22 = scalar_lea.hbm %s1590_s2, 128 }
  0x26   :  { %p1385_p2 = scmp.ne.s32.totalorder %s1590_s2, %s1384_s22  ;;  %p1388_p3 = scmp.lt.u32.totalorder %s1384_s22, %s1590_s2 }
  0x28   :  { %p1390_p4 = pnand %p1388_p3, %p1385_p2 }
  0x2a   :  { %1393 = shalt.err (!%p1390_p4)
}
  0x2b   :  { %s1394_s27 = scalar_lea.vmem %s43_s10, 128  ;;  %p1399_p6 = scmp.lt.s32.totalorder %s43_s10, %s43_s10 }
  0x2c   :  { %p1395_p5 = scmp.ne.s32.totalorder %s43_s10, %s1394_s27  ;;  %p1400_p7 = scmp.lt.s32.totalorder %s1394_s27, %s1394_s27 }
  0x2e   :  { %p1401_p8 = por %p1400_p7, %p1399_p6 }
  0x30   :  { %p1402_p9 = pnand %p1401_p8, %p1395_p5 }
  0x32   :  { %1405 = shalt.err (!%p1402_p9)
}
  0x33   :  { %45 = dma.hbm_to_vmem [thread:$0]  %s1590_s2, 128, %s43_s10, [#allocation6]  }
  0x34   :  { %s1463_s29 = smov [#allocation8]   ;;  %s1406_s8 = scalar_lea.hbm %s1591_s3, 8192 }
  0x35   :  { %s51_s30 = sshll.u32 %s1463_s29, 4  ;;  %p1407_p10 = scmp.ne.s32.totalorder %s1591_s3, %s1406_s8  ;;  %s52_s30 = int_to_ptr.vmem [resolvable:$true] %s51_s30 }
  0x36   :  { %p1410_p11 = scmp.lt.u32.totalorder %s1406_s8, %s1591_s3 }
  0x38   :  { %p1412_p12 = pnand %p1410_p11, %p1407_p10 }
  0x3a   :  { %1415 = shalt.err (!%p1412_p12)
}
  0x3b   :  { %s1416_s14 = scalar_lea.vmem %s52_s30, 8192  ;;  %p1421_p0 = scmp.lt.s32.totalorder %s52_s30, %s52_s30 }
  0x3c   :  { %p1417_p13 = scmp.ne.s32.totalorder %s52_s30, %s1416_s14  ;;  %p1422_p1 = scmp.lt.s32.totalorder %s1416_s14, %s1416_s14 }
  0x3e   :  { %p1423_p2 = por %p1422_p1, %p1421_p0 }
  0x40   :  { %p1424_p3 = pnand %p1423_p2, %p1417_p13 }
  0x42   :  { %1427 = shalt.err (!%p1424_p3)
}
  0x43   :  { %s1464_s2 = smov 64   ;;  %s1465_s10 = smov 4  }
  0x44   :  { %57 = dma.hbm_to_vmem [thread:$0]  %s1591_s3, 8192, %s52_s30, [#allocation9], %s1464_s2, %s1464_s2, %s1465_s10  }
  0x45   :  { %1450 = dma.done.wait [#allocation3], 64  }
  0x46   :  { %1451 = vsyncadd [#allocation3], 4294967232 }
  0x47   :  { %1452 = dma.done.wait [#allocation6], 2176  }
  0x48   :  { %1453 = vsyncadd [#allocation6], 4294965120 }
  0x49   :  { %1454 = dma.done.wait [#allocation9], 8192  }
  0x4a   :  { %1455 = vsyncadd [#allocation9], 4294959104  ;;  %v1466_v0 = vmov 0   ;;  %v74_v1 = vld [vmem:[#allocation5] sm:$0xff]  ;;  %v75_v3 = vld [vmem:[#allocation5 + $0x8] sm:$0xff]  ;;  %vm212_vm0 = vcmask 261120  }
  0x4b   :  { %248 = vmatprep.mubr.bf16.mxu0 %v1466_v0  ;;  %289 = vmatprep.mubr.bf16.mxu1 %v1466_v0  ;;  %v78_v2 = vld [vmem:[#allocation5 + $0x20] sm:$0xff]  ;;  %v79_v5 = vld [vmem:[#allocation5 + $0x28] sm:$0xff]  ;;  %v76_v15 = vld [vmem:[#allocation5 + $0x10] sm:$0xff] }
  0x4c   :  { %v1094_v4 = vcombine.high %v74_v1, %v78_v2  ;;  %v1093_v6 = vcombine.low %v74_v1, %v78_v2  ;;  %v82_v7 = vld [vmem:[#allocation5 + $0x40] sm:$0xff]  ;;  %v1096_v9 = vcombine.high %v75_v3, %v79_v5  ;;  %v1095_v10 = vcombine.low %v75_v3, %v79_v5  ;;  %v83_v12 = vld [vmem:[#allocation5 + $0x48] sm:$0xff]  ;;  %v80_v16 = vld [vmem:[#allocation5 + $0x30] sm:$0xff] }
  0x4d   :  { %v86_v8 = vld [vmem:[#allocation5 + $0x60] sm:$0xff]  ;;  %v87_v13 = vld [vmem:[#allocation5 + $0x68] sm:$0xff]  ;;  %v77_v17 = vld [vmem:[#allocation5 + $0x18] sm:$0xff]  ;;  %v1098_v21 = vcombine.high %v76_v15, %v80_v16  ;;  %v1097_v28 = vcombine.low %v76_v15, %v80_v16 }
  0x4e   :  { %v1102_v11 = vcombine.high %v82_v7, %v86_v8  ;;  %216 = vmatprep.subr.bf16.mxu0 %v1094_v4  ;;  %v1104_v14 = vcombine.high %v83_v12, %v87_v13  ;;  %257 = vmatprep.subr.bf16.mxu1 %v1096_v9  ;;  %v1101_v18 = vcombine.low %v82_v7, %v86_v8  ;;  %v81_v19 = vld [vmem:[#allocation5 + $0x38] sm:$0xff]  ;;  %v84_v22 = vld [vmem:[#allocation5 + $0x50] sm:$0xff]  ;;  %v1276_v34 = vld [vmem:[#allocation8 + $0x40] sm:$0xff]   ;;  %v92_v4 = vlaneseq }
  0x4f   :  { %217 = vmatpush1.bf16.msra.mxu0 %v1093_v6  ;;  %258 = vmatpush1.bf16.msra.mxu1 %v1095_v10  ;;  %v1103_v20 = vcombine.low %v83_v12, %v87_v13  ;;  %v88_v23 = vld [vmem:[#allocation5 + $0x70] sm:$0xff]  ;;  %v1100_v24 = vcombine.high %v77_v17, %v81_v19  ;;  %v85_v25 = vld [vmem:[#allocation5 + $0x58] sm:$0xff]  ;;  %v1099_v29 = vcombine.low %v77_v17, %v81_v19  ;;  %v1277_v35 = vld [vmem:[#allocation8 + $0xc0] sm:$0xff]  }
  0x50   :  { %218 = vmatprep.subr.bf16.mxu0 %v1102_v11  ;;  %259 = vmatprep.subr.bf16.mxu1 %v1104_v14  ;;  %v89_v26 = vld [vmem:[#allocation5 + $0x78] sm:$0xff]  ;;  %v1106_v30 = vcombine.high %v84_v22, %v88_v23  ;;  %v1105_v32 = vcombine.low %v84_v22, %v88_v23  ;;  %v1278_v36 = vld [vmem:[#allocation8] sm:$0xff]   ;;  %v1280_v38 = vld [vmem:[#allocation8 + $0x48] sm:$0xff]   ;;  %v1550_v5 = vshrl.u32 %v92_v4, 7 }
  0x51   :  { %v73_v27 = vld [vmem:[#allocation2] sm:$0xf]  ;;  %v1108_v31 = vcombine.high %v85_v25, %v89_v26  ;;  %v1107_v33 = vcombine.low %v85_v25, %v89_v26  ;;  %v1279_v37 = vld [vmem:[#allocation8 + $0x80] sm:$0xff]   ;;  %v1281_v39 = vld [vmem:[#allocation8 + $0xc8] sm:$0xff]  }
  0x52   :  { %v1282_v40 = vld [vmem:[#allocation8 + $0x8] sm:$0xff]   ;;  %v1284_v42 = vld [vmem:[#allocation8 + $0x50] sm:$0xff]   ;;  %v1288_v46 = vld [vmem:[#allocation8 + $0x58] sm:$0xff]   ;;  %v94_v6 = vsub.s32 0, %v1550_v5  ;;  %v102_v8 = vsub.s32 2, %v1550_v5  ;;  %v98_v9 = vsub.s32 1, %v1550_v5 }
  0x53   :  { %219 = vmatpush1.bf16.msra.mxu0 %v1101_v18  ;;  %260 = vmatpush1.bf16.msra.mxu1 %v1103_v20  ;;  %v1283_v41 = vld [vmem:[#allocation8 + $0x88] sm:$0xff]   ;;  %v1285_v43 = vld [vmem:[#allocation8 + $0xd0] sm:$0xff]   ;;  %v1289_v47 = vld [vmem:[#allocation8 + $0xd8] sm:$0xff]   ;;  %v106_v10 = vsub.s32 3, %v1550_v5  ;;  %v114_v23 = vsub.s32 5, %v1550_v5 }
  0x54   :  { %298 = vmatprep.subr.bf16.mxu0 %v1098_v21  ;;  %339 = vmatprep.subr.bf16.mxu1 %v1100_v24  ;;  %v1286_v44 = vld [vmem:[#allocation8 + $0x10] sm:$0xff]   ;;  %v1290_v48 = vld [vmem:[#allocation8 + $0x18] sm:$0xff]   ;;  %v1292_v50 = vld [vmem:[#allocation8 + $0x60] sm:$0xff]  }
  0x55   :  { %v1287_v45 = vld [vmem:[#allocation8 + $0x90] sm:$0xff]   ;;  %v1291_v49 = vld [vmem:[#allocation8 + $0x98] sm:$0xff]   ;;  %v1293_v51 = vld [vmem:[#allocation8 + $0xe0] sm:$0xff]  }
  0x56   :  { %1109 = vmatmul.mubr.msk.bf16.vlgmr.msra.gmra.mrb[0].mxu0 %vm212_vm0, %v73_v27  ;;  %1110 = vmatmul.mubr.msk.bf16.vlgmr.msra.gmra.mrb[0].mxu1 %vm212_vm0, %v73_v27  ;;  %v1294_v52 = vld [vmem:[#allocation8 + $0x20] sm:$0xff]   ;;  %v1296_v54 = vld [vmem:[#allocation8 + $0x68] sm:$0xff]   ;;  %v1300_v58 = vld [vmem:[#allocation8 + $0x70] sm:$0xff]  }
  0x57   :  { %299 = vmatpush1.bf16.msra.mxu0 %v1097_v28  ;;  %340 = vmatpush1.bf16.msra.mxu1 %v1099_v29  ;;  %v1295_v53 = vld [vmem:[#allocation8 + $0xa0] sm:$0xff]   ;;  %v1297_v55 = vld [vmem:[#allocation8 + $0xe8] sm:$0xff]   ;;  %v1301_v59 = vld [vmem:[#allocation8 + $0xf0] sm:$0xff]   ;;  %v122_v28 = vsub.s32 7, %v1550_v5 }
  0x58   :  { %300 = vmatprep.subr.bf16.mxu0 %v1106_v30  ;;  %341 = vmatprep.subr.bf16.mxu1 %v1108_v31  ;;  %v1298_v56 = vld [vmem:[#allocation8 + $0x28] sm:$0xff]   ;;  %v1302_v60 = vld [vmem:[#allocation8 + $0x30] sm:$0xff]   ;;  %v1304_v62 = vld [vmem:[#allocation8 + $0x78] sm:$0xff]  }
  0x59   :  { %330 = vmatprep.mubr.bf16.mxu0 %v1466_v0  ;;  %371 = vmatprep.mubr.bf16.mxu1 %v1466_v0  ;;  %v1299_v57 = vld [vmem:[#allocation8 + $0xa8] sm:$0xff]   ;;  %v1303_v61 = vld [vmem:[#allocation8 + $0xb0] sm:$0xff]   ;;  %v1305_v63 = vld [vmem:[#allocation8 + $0xf8] sm:$0xff]  }
  0x5a   :  { %v1306_v0 = vld [vmem:[#allocation8 + $0x38] sm:$0xff]   ;;  %v1308_v2 = vld [vmem:[#allocation8 + $0x140] sm:$0xff]  }
  0x5b   :  { %301 = vmatpush1.bf16.msra.mxu0 %v1105_v32  ;;  %342 = vmatpush1.bf16.msra.mxu1 %v1107_v33  ;;  %v1307_v1 = vld [vmem:[#allocation8 + $0xb8] sm:$0xff]   ;;  %v1309_v3 = vld [vmem:[#allocation8 + $0x1c0] sm:$0xff]  }
  0x5c   :  { %1178 = vmatprep.subr.bf16.mxu0 %v1276_v34  ;;  %1200 = vmatprep.subr.bf16.mxu1 %v1277_v35  ;;  %v1553_v7 = vld [vmem:[#allocation7] sm:$0xff]  ;;  %v1310_v35 = vld [vmem:[#allocation8 + $0x100] sm:$0xff]  }
  0x5d   :  { %v95_v11 = vrot.slane %v1553_v7, %v94_v6  ;;  %v103_v12 = vrot.slane %v1553_v7, %v102_v8  ;;  %v99_v13 = vrot.slane %v1553_v7, %v98_v9  ;;  %v107_v14 = vrot.slane %v1553_v7, %v106_v10  ;;  %v1325_v4 = vld [vmem:[#allocation8 + $0x1e0] sm:$0xff]  }
  0x5e   :  { %1111 = vmatmul.mubr.msk.bf16.vlgmr.msra.gmra.mrb[4].mxu0 %vm212_vm0, %v73_v27  ;;  %1112 = vmatmul.mubr.msk.bf16.vlgmr.msra.gmra.mrb[4].mxu1 %vm212_vm0, %v73_v27  ;;  %v1326_v6 = vld [vmem:[#allocation8 + $0x120] sm:$0xff]   ;;  %v118_v8 = vsub.s32 6, %v1550_v5  ;;  %v110_v10 = vsub.s32 4, %v1550_v5 }
  0x5f   :  { %1179 = vmatpush3.bf16.msra.mxu0 %v1278_v36  ;;  %1201 = vmatpush3.bf16.msra.mxu1 %v1279_v37  ;;  %v115_v36 = vrot.slane %v1553_v7, %v114_v23  ;;  %v1327_v9 = vld [vmem:[#allocation8 + $0x1a0] sm:$0xff]   ;;  %v1337_v23 = vld [vmem:[#allocation8 + $0x1f8] sm:$0xff]  }
  0x60   :  { %1180 = vmatprep.subr.bf16.mxu0 %v1280_v38  ;;  %1202 = vmatprep.subr.bf16.mxu1 %v1281_v39  ;;  %v1311_v39 = vld [vmem:[#allocation8 + $0x180] sm:$0xff]  }
  0x63   :  { %1181 = vmatpush3.bf16.msra.mxu0 %v1282_v40  ;;  %1203 = vmatpush3.bf16.msra.mxu1 %v1283_v41  ;;  %v1312_v40 = vld [vmem:[#allocation8 + $0x148] sm:$0xff]   ;;  %v123_v41 = vrot.slane %v1553_v7, %v122_v28 }
  0x64   :  { %1182 = vmatprep.subr.bf16.mxu0 %v1284_v42  ;;  %1204 = vmatprep.subr.bf16.mxu1 %v1285_v43  ;;  %v1313_v42 = vld [vmem:[#allocation8 + $0x1c8] sm:$0xff]  }
  0x67   :  { %1183 = vmatpush3.bf16.msra.mxu0 %v1286_v44  ;;  %1205 = vmatpush3.bf16.msra.mxu1 %v1287_v45 }
  0x68   :  { %1184 = vmatprep.subr.bf16.mxu0 %v1288_v46  ;;  %1206 = vmatprep.subr.bf16.mxu1 %v1289_v47  ;;  %v1314_v46 = vld [vmem:[#allocation8 + $0x108] sm:$0xff]  }
  0x6b   :  { %1185 = vmatpush3.bf16.msra.mxu0 %v1290_v48  ;;  %1207 = vmatpush3.bf16.msra.mxu1 %v1291_v49 }
  0x6c   :  { %1186 = vmatprep.subr.bf16.mxu0 %v1292_v50  ;;  %1208 = vmatprep.subr.bf16.mxu1 %v1293_v51  ;;  %v1315_v50 = vld [vmem:[#allocation8 + $0x188] sm:$0xff]   ;;  %v1316_v51 = vld [vmem:[#allocation8 + $0x150] sm:$0xff]  }
  0x6f   :  { %1187 = vmatpush3.bf16.msra.mxu0 %v1294_v52  ;;  %1209 = vmatpush3.bf16.msra.mxu1 %v1295_v53 }
  0x70   :  { %1188 = vmatprep.subr.bf16.mxu0 %v1296_v54  ;;  %1210 = vmatprep.subr.bf16.mxu1 %v1297_v55  ;;  %v1317_v55 = vld [vmem:[#allocation8 + $0x1d0] sm:$0xff]  }
  0x73   :  { %1189 = vmatpush3.bf16.msra.mxu0 %v1298_v56  ;;  %1211 = vmatpush3.bf16.msra.mxu1 %v1299_v57 }
  0x74   :  { %1190 = vmatprep.subr.bf16.mxu0 %v1300_v58  ;;  %1212 = vmatprep.subr.bf16.mxu1 %v1301_v59  ;;  %v1318_v59 = vld [vmem:[#allocation8 + $0x110] sm:$0xff]  }
  0x77   :  { %1191 = vmatpush3.bf16.msra.mxu0 %v1302_v60  ;;  %1213 = vmatpush3.bf16.msra.mxu1 %v1303_v61  ;;  %v1319_v61 = vld [vmem:[#allocation8 + $0x190] sm:$0xff]  }
  0x78   :  { %1192 = vmatprep.subr.bf16.mxu0 %v1304_v62  ;;  %1214 = vmatprep.subr.bf16.mxu1 %v1305_v63  ;;  %v1320_v62 = vld [vmem:[#allocation8 + $0x158] sm:$0xff]  }
  0x7b   :  { %1193 = vmatpush3.bf16.msra.mxu0 %v1306_v0  ;;  %1215 = vmatpush3.bf16.msra.mxu1 %v1307_v1  ;;  %v1321_v0 = vld [vmem:[#allocation8 + $0x1d8] sm:$0xff]  }
  0x7c   :  { %1222 = vmatprep.subr.bf16.mxu0 %v1308_v2  ;;  %1244 = vmatprep.subr.bf16.mxu1 %v1309_v3  ;;  %v1322_v1 = vld [vmem:[#allocation8 + $0x118] sm:$0xff]   ;;  %v1324_v3 = vld [vmem:[#allocation8 + $0x160] sm:$0xff]  }
  0x7d   :  { %v1323_v2 = vld [vmem:[#allocation8 + $0x198] sm:$0xff]  }
 0x129   :  { %v250_v15 = vpop.f32.mrb[0].mxu0  ;;  %v291_v17 = vpop.f32.mrb[0].mxu1 }
 0x12a   :  { %v251_v16 = vadd.f32 %v250_v15, %v95_v11  ;;  %v252_v18 = vpop.f32.mrb[1].mxu0  ;;  %v292_v19 = vadd.f32 %v291_v17, %v103_v12  ;;  %v293_v21 = vpop.f32.mrb[1].mxu1  ;;  %v1328_v11 = vld [vmem:[#allocation8 + $0x168] sm:$0xff]   ;;  %v111_v15 = vrot.slane %v1553_v7, %v110_v10  ;;  %v1332_v17 = vld [vmem:[#allocation8 + $0x170] sm:$0xff]  }
 0x12b   :  { %v253_v20 = vadd.f32 %v252_v18, %v99_v13  ;;  %v254_v22 = vpop.f32.mrb[2].mxu0  ;;  %v294_v25 = vadd.f32 %v293_v21, %v107_v14  ;;  %v295_v26 = vpop.f32.mrb[2].mxu1  ;;  %v1329_v12 = vld [vmem:[#allocation8 + $0x1e8] sm:$0xff]   ;;  %v119_v14 = vrot.slane %v1553_v7, %v118_v8  ;;  %v1333_v18 = vld [vmem:[#allocation8 + $0x1f0] sm:$0xff]  }
 0x12c   :  { %v380_v24 = vmax.f32 %v251_v16, 0.0  ;;  %v255_v27 = vpop.f32.mrb[3].mxu0  ;;  %v382_v29 = vmax.f32 %v292_v19, 0.0  ;;  %v296_v31 = vpop.f32.mrb[3].mxu1  ;;  %v1330_v13 = vld [vmem:[#allocation8 + $0x128] sm:$0xff]   ;;  %v1335_v21 = vld [vmem:[#allocation8 + $0x1b0] sm:$0xff]  }
 0x12d   :  { %v381_v30 = vmax.f32 %v253_v20, 0.0  ;;  %v383_v32 = vmax.f32 %v294_v25, 0.0  ;;  %v1331_v16 = vld [vmem:[#allocation8 + $0x1a8] sm:$0xff]   ;;  %v1334_v20 = vld [vmem:[#allocation8 + $0x130] sm:$0xff]   ;;  %v1336_v22 = vld [vmem:[#allocation8 + $0x178] sm:$0xff]  }
 0x12e   :  { %v390_v33 = vpack.c.bf16 %v382_v29, %v382_v29  ;;  %v388_v37 = vpack.c.bf16 %v380_v24, %v380_v24  ;;  %v1338_v25 = vld [vmem:[#allocation8 + $0x138] sm:$0xff]   ;;  %v1113_v31 = vld [vmem:[%s1592_s4] ss:$0 sm:$0xff]  ;;  %s1467_s4 = smov [#allocation10]  }
 0x12f   :  { %v389_v34 = vpack.c.bf16 %v381_v30, %v381_v30  ;;  %v391_v38 = vpack.c.bf16 %v383_v32, %v383_v32  ;;  %v1339_v26 = vld [vmem:[#allocation8 + $0x1b8] sm:$0xff]   ;;  %s1082_s1 = sshll.u32 %s1467_s4, 4  ;;  %s1083_s1 = int_to_ptr.vmem [resolvable:$true] %s1082_s1 }
 0x130   :  { %s1428_s18 = scalar_lea.vmem %s1083_s1, 128  ;;  %p1433_p5 = scmp.lt.s32.totalorder %s1083_s1, %s1083_s1 }
 0x131   :  { %947 = vmatprep.mubr.bf16.mxu0 %v389_v34  ;;  %v1566_v43 = vpop.f32.mrb[4].mxu0  ;;  %987 = vmatprep.mubr.bf16.mxu1 %v391_v38  ;;  %v373_v45 = vpop.f32.mrb[4].mxu1  ;;  %p1429_p4 = scmp.ne.s32.totalorder %s1083_s1, %s1428_s18  ;;  %p1434_p6 = scmp.lt.s32.totalorder %s1428_s18, %s1428_s18 }
 0x132   :  { %948 = vmatmul.mubr.bf16.vlgmr.msra.gmra.mrb[8].mxu0 %v388_v37  ;;  %v334_v44 = vpop.f32.mrb[5].mxu0  ;;  %988 = vmatmul.mubr.bf16.vlgmr.msra.gmra.mrb[8].mxu1 %v390_v33  ;;  %v375_v49 = vpop.f32.mrb[5].mxu1  ;;  %v374_v19 = vadd.f32 %v373_v45, %v119_v14  ;;  %v333_v5 = vadd.f32 %v1566_v43, %v111_v15 }
 0x133   :  { %1223 = vmatpush3.bf16.msra.mxu0 %v1310_v35  ;;  %v335_v47 = vadd.f32 %v334_v44, %v115_v36  ;;  %v336_v48 = vpop.f32.mrb[6].mxu0  ;;  %1245 = vmatpush3.bf16.msra.mxu1 %v1311_v39  ;;  %v376_v53 = vadd.f32 %v375_v49, %v123_v41  ;;  %v377_v54 = vpop.f32.mrb[6].mxu1  ;;  %p1435_p7 = por %p1434_p6, %p1433_p5 }
 0x134   :  { %1224 = vmatprep.subr.bf16.mxu0 %v1312_v40  ;;  %v337_v52 = vpop.f32.mrb[7].mxu0  ;;  %1246 = vmatprep.subr.bf16.mxu1 %v1313_v42  ;;  %v378_v57 = vpop.f32.mrb[7].mxu1  ;;  %v386_v24 = vmax.f32 %v374_v19, 0.0  ;;  %v384_v7 = vmax.f32 %v333_v5, 0.0 }
 0x135   :  { %v385_v56 = vmax.f32 %v335_v47, 0.0  ;;  %v387_v58 = vmax.f32 %v376_v53, 0.0  ;;  %p1436_p8 = pnand %p1435_p7, %p1429_p4 }
 0x136   :  { %v394_v27 = vpack.c.bf16 %v386_v24, %v386_v24  ;;  %v392_v28 = vpack.c.bf16 %v384_v7, %v384_v7 }
 0x137   :  { %1225 = vmatpush3.bf16.msra.mxu0 %v1314_v46  ;;  %v393_v60 = vpack.c.bf16 %v385_v56, %v385_v56  ;;  %1247 = vmatpush3.bf16.msra.mxu1 %v1315_v50  ;;  %v395_v63 = vpack.c.bf16 %v387_v58, %v387_v58 }
 0x138   :  { %1226 = vmatprep.subr.bf16.mxu0 %v1316_v51  ;;  %1248 = vmatprep.subr.bf16.mxu1 %v1317_v55 }
 0x139   :  { %1027 = vmatprep.mubr.bf16.mxu0 %v393_v60  ;;  %1067 = vmatprep.mubr.bf16.mxu1 %v395_v63 }
 0x13b   :  { %1227 = vmatpush3.bf16.msra.mxu0 %v1318_v59  ;;  %1249 = vmatpush3.bf16.msra.mxu1 %v1319_v61 }
 0x13c   :  { %1228 = vmatprep.subr.bf16.mxu0 %v1320_v62  ;;  %1250 = vmatprep.subr.bf16.mxu1 %v1321_v0 }
 0x13f   :  { %1229 = vmatpush3.bf16.msra.mxu0 %v1322_v1  ;;  %1251 = vmatpush3.bf16.msra.mxu1 %v1323_v2 }
 0x140   :  { %1230 = vmatprep.subr.bf16.mxu0 %v1324_v3  ;;  %1252 = vmatprep.subr.bf16.mxu1 %v1325_v4 }
 0x143   :  { %1231 = vmatpush3.bf16.msra.mxu0 %v1326_v6  ;;  %1253 = vmatpush3.bf16.msra.mxu1 %v1327_v9 }
 0x144   :  { %1232 = vmatprep.subr.bf16.mxu0 %v1328_v11  ;;  %1254 = vmatprep.subr.bf16.mxu1 %v1329_v12 }
 0x147   :  { %1233 = vmatpush3.bf16.msra.mxu0 %v1330_v13  ;;  %1255 = vmatpush3.bf16.msra.mxu1 %v1331_v16 }
 0x148   :  { %1234 = vmatprep.subr.bf16.mxu0 %v1332_v17  ;;  %1256 = vmatprep.subr.bf16.mxu1 %v1333_v18 }
 0x14b   :  { %1235 = vmatpush3.bf16.msra.mxu0 %v1334_v20  ;;  %1257 = vmatpush3.bf16.msra.mxu1 %v1335_v21 }
 0x14c   :  { %1236 = vmatprep.subr.bf16.mxu0 %v1336_v22  ;;  %1258 = vmatprep.subr.bf16.mxu1 %v1337_v23 }
 0x14f   :  { %1237 = vmatpush3.bf16.msra.mxu0 %v1338_v25  ;;  %1259 = vmatpush3.bf16.msra.mxu1 %v1339_v26 }
 0x152   :  { %1028 = vmatmul.mubr.bf16.vlgmr.msra.gmra.mrb[12].mxu0 %v392_v28  ;;  %1068 = vmatmul.mubr.bf16.vlgmr.msra.gmra.mrb[12].mxu1 %v394_v27 }
 0x205   :  { %v1194_v29 = vpop.f32.mrb[8].mxu0  ;;  %v1216_v30 = vpop.f32.mrb[8].mxu1 }
 0x206   :  { %v1195_v32 = vpop.f32.mrb[9].mxu0  ;;  %v1217_v34 = vpop.f32.mrb[9].mxu1 }
 0x207   :  { %v1196_v33 = vadd.f32 %v1195_v32, %v1194_v29  ;;  %v1197_v35 = vpop.f32.mrb[10].mxu0  ;;  %v1218_v36 = vadd.f32 %v1217_v34, %v1216_v30  ;;  %v1219_v37 = vpop.f32.mrb[10].mxu1 }
 0x208   :  { %v1198_v38 = vpop.f32.mrb[11].mxu0  ;;  %v1220_v40 = vpop.f32.mrb[11].mxu1 }
 0x209   :  { %v950_v39 = vadd.f32 %v1196_v33, %v1113_v31 }
 0x20b   :  { %v990_v41 = vadd.f32 %v1218_v36, %v950_v39 }
 0x225   :  { %v1238_v42 = vpop.f32.mrb[12].mxu0  ;;  %v1260_v43 = vpop.f32.mrb[12].mxu1 }
 0x226   :  { %v1239_v44 = vpop.f32.mrb[13].mxu0  ;;  %v1261_v46 = vpop.f32.mrb[13].mxu1 }
 0x227   :  { %v1240_v45 = vadd.f32 %v1239_v44, %v1238_v42  ;;  %v1241_v47 = vpop.f32.mrb[14].mxu0  ;;  %v1262_v48 = vadd.f32 %v1261_v46, %v1260_v43  ;;  %v1263_v49 = vpop.f32.mrb[14].mxu1 }
 0x228   :  { %v1242_v50 = vpop.f32.mrb[15].mxu0  ;;  %v1264_v52 = vpop.f32.mrb[15].mxu1 }
 0x229   :  { %v1030_v51 = vadd.f32 %v1240_v45, %v990_v41 }
 0x22b   :  { %v1070_v53 = vadd.f32 %v1262_v48, %v1030_v51 }
 0x22d   :  { %1075 = vst [vmem:[#allocation10] sm:$0xff] %v1070_v53 }
 0x22e   :  { %1439 = shalt.err (!%p1436_p8)
}
 0x22f   :  { %s1440_s21 = scalar_lea.hbm %s1593_s5, 128 }
 0x230   :  { %p1441_p9 = scmp.ne.s32.totalorder %s1593_s5, %s1440_s21  ;;  %p1444_p10 = scmp.lt.u32.totalorder %s1440_s21, %s1593_s5 }
 0x232   :  { %p1446_p11 = pnand %p1444_p10, %p1441_p9 }
 0x234   :  { %1449 = shalt.err (!%p1446_p11)
}
 0x235   :  { %1085 = dma.vmem_to_hbm [thread:$0]  %s1083_s1, 128, %s1593_s5, [#allocation4]  }
 0x236   :  { %1456 = dma.done.wait [#allocation4], 128  }
 0x237   :  { %1457 = vsyncadd [#allocation4], 4294967168 }
 0x238   :  { %1089 = vsyncpa [#allocation3], 1 }
 0x239   :  { %1090 = vsyncpa [#allocation6], 1 }
 0x23a   :  { %1091 = vsyncpa [#allocation9], 1 }
 0x23b   :  { %1092 = vsyncpa [#allocation4], 1 }

// kernel: tpu_custom_call.1
= control target key start
LH: loop header
LB: loop body
LE: loop exit
PB: predicated region body
PF: predicated region fallthrough
CT: control target
= control target key end

     0   :  { %10 = vsyncpa [#allocation3], 0  ;;  %s1588_s0 = inlined_call_operand.hbm [shape: bf16[8,32], index: 0, kind: input, shape index: {}]   ;;  %s1589_s1 = inlined_call_operand.hbm [shape: bf16[32,1024], index: 1, kind: input, shape index: {}]   ;;  %s1590_s2 = inlined_call_operand.hbm [shape: f32[1,1024], index: 2, kind: input, shape index: {}]   ;;  %s1591_s3 = inlined_call_operand.hbm [shape: bf16[1024,128], index: 3, kind: input, shape index: {}]   ;;  %s1592_s4 = inlined_call_operand.vmem [shape: f32[1,128], index: 4, kind: input, shape index: {}]   ;;  %s1593_s5 = inlined_call_operand.hbm [shape: f32[8,128], index: 5, kind: output, shape index: {}]  }
   0x1   :  { %11 = vsyncpa [#allocation6], 0 }
   0x2   :  { %12 = vsyncpa [#allocation9], 0 }
   0x3   :  { %13 = vsyncpa [#allocation4], 0  ;;  %s1458_s18 = smov [#allocation5]   ;;  %s1340_s22 = scalar_lea.hbm %s1589_s1, 2048 }
   0x4   :  { %s29_s19 = sshll.u32 %s1458_s18, 4  ;;  %p1341_p0 = scmp.ne.s32.totalorder %s1589_s1, %s1340_s22  ;;  %s30_s19 = int_to_ptr.vmem [resolvable:$true] %s29_s19 }
   0x5   :  { %p1344_p1 = scmp.lt.u32.totalorder %s1340_s22, %s1589_s1 }
   0x7   :  { %p1346_p2 = pnand %p1344_p1, %p1341_p0 }
   0x9   :  { %1349 = shalt.err (!%p1346_p2)
}
   0xa   :  { %s1350_s27 = scalar_lea.vmem %s30_s19, 2048  ;;  %p1355_p4 = scmp.lt.s32.totalorder %s30_s19, %s30_s19 }
   0xb   :  { %p1351_p3 = scmp.ne.s32.totalorder %s30_s19, %s1350_s27  ;;  %p1356_p5 = scmp.lt.s32.totalorder %s1350_s27, %s1350_s27 }
   0xd   :  { %p1357_p6 = por %p1356_p5, %p1355_p4 }
   0xf   :  { %p1358_p7 = pnand %p1357_p6, %p1351_p3 }
  0x11   :  { %1361 = shalt.err (!%p1358_p7)
}
  0x12   :  { %s1459_s28 = smov 512   ;;  %s1460_s29 = smov 32  }
  0x13   :  { %35 = dma.hbm_to_vmem [thread:$0]  %s1589_s1, 2048, %s30_s19, [#allocation6], %s1459_s28, %s1459_s28, %s1460_s29  }
  0x14   :  { %s1461_s7 = smov [#allocation2]   ;;  %s1462_s9 = smov [#allocation7]  }
  0x15   :  { %s20_s8 = sshll.u32 %s1461_s7, 4  ;;  %s42_s10 = sshll.u32 %s1462_s9, 4  ;;  %s21_s8 = int_to_ptr.vmem [resolvable:$true] %s20_s8  ;;  %s43_s10 = int_to_ptr.vmem [resolvable:$true] %s42_s10 }
  0x16   :  { %s1362_s13 = scalar_lea.hbm %s1588_s0, 64 }
  0x17   :  { %p1363_p8 = scmp.ne.s32.totalorder %s1588_s0, %s1362_s13  ;;  %p1366_p9 = scmp.lt.u32.totalorder %s1362_s13, %s1588_s0 }
  0x19   :  { %p1368_p10 = pnand %p1366_p9, %p1363_p8 }
  0x1b   :  { %1371 = shalt.err (!%p1368_p10)
}
  0x1c   :  { %s1372_s1 = scalar_lea.vmem %s21_s8, 64  ;;  %p1377_p12 = scmp.lt.s32.totalorder %s21_s8, %s21_s8 }
  0x1d   :  { %p1373_p11 = scmp.ne.s32.totalorder %s21_s8, %s1372_s1  ;;  %p1378_p13 = scmp.lt.s32.totalorder %s1372_s1, %s1372_s1 }
  0x1f   :  { %p1379_p0 = por %p1378_p13, %p1377_p12 }
  0x21   :  { %p1380_p1 = pnand %p1379_p0, %p1373_p11 }
  0x23   :  { %1383 = shalt.err (!%p1380_p1)
}
  0x24   :  { %23 = dma.hbm_to_vmem [thread:$0]  %s1588_s0, 64, %s21_s8, [#allocation3]  }
  0x25   :  { %s1384_s22 = scalar_lea.hbm %s1590_s2, 128 }
  0x26   :  { %p1385_p2 = scmp.ne.s32.totalorder %s1590_s2, %s1384_s22  ;;  %p1388_p3 = scmp.lt.u32.totalorder %s1384_s22, %s1590_s2 }
  0x28   :  { %p1390_p4 = pnand %p1388_p3, %p1385_p2 }
  0x2a   :  { %1393 = shalt.err (!%p1390_p4)
}
  0x2b   :  { %s1394_s27 = scalar_lea.vmem %s43_s10, 128  ;;  %p1399_p6 = scmp.lt.s32.totalorder %s43_s10, %s43_s10 }
  0x2c   :  { %p1395_p5 = scmp.ne.s32.totalorder %s43_s10, %s1394_s27  ;;  %p1400_p7 = scmp.lt.s32.totalorder %s1394_s27, %s1394_s27 }
  0x2e   :  { %p1401_p8 = por %p1400_p7, %p1399_p6 }
  0x30   :  { %p1402_p9 = pnand %p1401_p8, %p1395_p5 }
  0x32   :  { %1405 = shalt.err (!%p1402_p9)
}
  0x33   :  { %45 = dma.hbm_to_vmem [thread:$0]  %s1590_s2, 128, %s43_s10, [#allocation6]  }
  0x34   :  { %s1463_s29 = smov [#allocation8]   ;;  %s1406_s8 = scalar_lea.hbm %s1591_s3, 8192 }
  0x35   :  { %s51_s30 = sshll.u32 %s1463_s29, 4  ;;  %p1407_p10 = scmp.ne.s32.totalorder %s1591_s3, %s1406_s8  ;;  %s52_s30 = int_to_ptr.vmem [resolvable:$true] %s51_s30 }
  0x36   :  { %p1410_p11 = scmp.lt.u32.totalorder %s1406_s8, %s1591_s3 }
  0x38   :  { %p1412_p12 = pnand %p1410_p11, %p1407_p10 }
  0x3a   :  { %1415 = shalt.err (!%p1412_p12)
}
  0x3b   :  { %s1416_s14 = scalar_lea.vmem %s52_s30, 8192  ;;  %p1421_p0 = scmp.lt.s32.totalorder %s52_s30, %s52_s30 }
  0x3c   :  { %p1417_p13 = scmp.ne.s32.totalorder %s52_s30, %s1416_s14  ;;  %p1422_p1 = scmp.lt.s32.totalorder %s1416_s14, %s1416_s14 }
  0x3e   :  { %p1423_p2 = por %p1422_p1, %p1421_p0 }
  0x40   :  { %p1424_p3 = pnand %p1423_p2, %p1417_p13 }
  0x42   :  { %1427 = shalt.err (!%p1424_p3)
}
  0x43   :  { %s1464_s2 = smov 64   ;;  %s1465_s10 = smov 4  }
  0x44   :  { %57 = dma.hbm_to_vmem [thread:$0]  %s1591_s3, 8192, %s52_s30, [#allocation9], %s1464_s2, %s1464_s2, %s1465_s10  }
  0x45   :  { %1450 = dma.done.wait [#allocation3], 64  }
  0x46   :  { %1451 = vsyncadd [#allocation3], 4294967232 }
  0x47   :  { %1452 = dma.done.wait [#allocation6], 2176  }
  0x48   :  { %1453 = vsyncadd [#allocation6], 4294965120 }
  0x49   :  { %1454 = dma.done.wait [#allocation9], 8192  }
  0x4a   :  { %1455 = vsyncadd [#allocation9], 4294959104  ;;  %v1466_v0 = vmov 0   ;;  %v74_v1 = vld [vmem:[#allocation5] sm:$0xff]  ;;  %v75_v3 = vld [vmem:[#allocation5 + $0x8] sm:$0xff]  ;;  %vm212_vm0 = vcmask 261120  }
  0x4b   :  { %248 = vmatprep.mubr.bf16.mxu0 %v1466_v0  ;;  %289 = vmatprep.mubr.bf16.mxu1 %v1466_v0  ;;  %v78_v2 = vld [vmem:[#allocation5 + $0x20] sm:$0xff]  ;;  %v79_v5 = vld [vmem:[#allocation5 + $0x28] sm:$0xff]  ;;  %v76_v15 = vld [vmem:[#allocation5 + $0x10] sm:$0xff] }
  0x4c   :  { %v1094_v4 = vcombine.high %v74_v1, %v78_v2  ;;  %v1093_v6 = vcombine.low %v74_v1, %v78_v2  ;;  %v82_v7 = vld [vmem:[#allocation5 + $0x40] sm:$0xff]  ;;  %v1096_v9 = vcombine.high %v75_v3, %v79_v5  ;;  %v1095_v10 = vcombine.low %v75_v3, %v79_v5  ;;  %v83_v12 = vld [vmem:[#allocation5 + $0x48] sm:$0xff]  ;;  %v80_v16 = vld [vmem:[#allocation5 + $0x30] sm:$0xff] }
  0x4d   :  { %v86_v8 = vld [vmem:[#allocation5 + $0x60] sm:$0xff]  ;;  %v87_v13 = vld [vmem:[#allocation5 + $0x68] sm:$0xff]  ;;  %v77_v17 = vld [vmem:[#allocation5 + $0x18] sm:$0xff]  ;;  %v1098_v21 = vcombine.high %v76_v15, %v80_v16  ;;  %v1097_v28 = vcombine.low %v76_v15, %v80_v16 }
  0x4e   :  { %v1102_v11 = vcombine.high %v82_v7, %v86_v8  ;;  %216 = vmatprep.subr.bf16.mxu0 %v1094_v4  ;;  %v1104_v14 = vcombine.high %v83_v12, %v87_v13  ;;  %257 = vmatprep.subr.bf16.mxu1 %v1096_v9  ;;  %v1101_v18 = vcombine.low %v82_v7, %v86_v8  ;;  %v81_v19 = vld [vmem:[#allocation5 + $0x38] sm:$0xff]  ;;  %v84_v22 = vld [vmem:[#allocation5 + $0x50] sm:$0xff]  ;;  %v1276_v34 = vld [vmem:[#allocation8 + $0x40] sm:$0xff]   ;;  %v92_v4 = vlaneseq }
  0x4f   :  { %217 = vmatpush1.bf16.msra.mxu0 %v1093_v6  ;;  %258 = vmatpush1.bf16.msra.mxu1 %v1095_v10  ;;  %v1103_v20 = vcombine.low %v83_v12, %v87_v13  ;;  %v88_v23 = vld [vmem:[#allocation5 + $0x70] sm:$0xff]  ;;  %v1100_v24 = vcombine.high %v77_v17, %v81_v19  ;;  %v85_v25 = vld [vmem:[#allocation5 + $0x58] sm:$0xff]  ;;  %v1099_v29 = vcombine.low %v77_v17, %v81_v19  ;;  %v1277_v35 = vld [vmem:[#allocation8 + $0xc0] sm:$0xff]  }
  0x50   :  { %218 = vmatprep.subr.bf16.mxu0 %v1102_v11  ;;  %259 = vmatprep.subr.bf16.mxu1 %v1104_v14  ;;  %v89_v26 = vld [vmem:[#allocation5 + $0x78] sm:$0xff]  ;;  %v1106_v30 = vcombine.high %v84_v22, %v88_v23  ;;  %v1105_v32 = vcombine.low %v84_v22, %v88_v23  ;;  %v1278_v36 = vld [vmem:[#allocation8] sm:$0xff]   ;;  %v1280_v38 = vld [vmem:[#allocation8 + $0x48] sm:$0xff]   ;;  %v1550_v5 = vshrl.u32 %v92_v4, 7 }
  0x51   :  { %v73_v27 = vld [vmem:[#allocation2] sm:$0xf]  ;;  %v1108_v31 = vcombine.high %v85_v25, %v89_v26  ;;  %v1107_v33 = vcombine.low %v85_v25, %v89_v26  ;;  %v1279_v37 = vld [vmem:[#allocation8 + $0x80] sm:$0xff]   ;;  %v1281_v39 = vld [vmem:[#allocation8 + $0xc8] sm:$0xff]  }
  0x52   :  { %v1282_v40 = vld [vmem:[#allocation8 + $0x8] sm:$0xff]   ;;  %v1284_v42 = vld [vmem:[#allocation8 + $0x50] sm:$0xff]   ;;  %v1288_v46 = vld [vmem:[#allocation8 + $0x58] sm:$0xff]   ;;  %v94_v6 = vsub.s32 0, %v1550_v5  ;;  %v102_v8 = vsub.s32 2, %v1550_v5  ;;  %v98_v9 = vsub.s32 1, %v1550_v5 }
  0x53   :  { %219 = vmatpush1.bf16.msra.mxu0 %v1101_v18  ;;  %260 = vmatpush1.bf16.msra.mxu1 %v1103_v20  ;;  %v1283_v41 = vld [vmem:[#allocation8 + $0x88] sm:$0xff]   ;;  %v1285_v43 = vld [vmem:[#allocation8 + $0xd0] sm:$0xff]   ;;  %v1289_v47 = vld [vmem:[#allocation8 + $0xd8] sm:$0xff]   ;;  %v106_v10 = vsub.s32 3, %v1550_v5  ;;  %v114_v23 = vsub.s32 5, %v1550_v5 }
  0x54   :  { %298 = vmatprep.subr.bf16.mxu0 %v1098_v21  ;;  %339 = vmatprep.subr.bf16.mxu1 %v1100_v24  ;;  %v1286_v44 = vld [vmem:[#allocation8 + $0x10] sm:$0xff]   ;;  %v1290_v48 = vld [vmem:[#allocation8 + $0x18] sm:$0xff]   ;;  %v1292_v50 = vld [vmem:[#allocation8 + $0x60] sm:$0xff]  }
  0x55   :  { %v1287_v45 = vld [vmem:[#allocation8 + $0x90] sm:$0xff]   ;;  %v1291_v49 = vld [vmem:[#allocation8 + $0x98] sm:$0xff]   ;;  %v1293_v51 = vld [vmem:[#allocation8 + $0xe0] sm:$0xff]  }
  0x56   :  { %1109 = vmatmul.mubr.msk.bf16.vlgmr.msra.gmra.mrb[0].mxu0 %vm212_vm0, %v73_v27  ;;  %1110 = vmatmul.mubr.msk.bf16.vlgmr.msra.gmra.mrb[0].mxu1 %vm212_vm0, %v73_v27  ;;  %v1294_v52 = vld [vmem:[#allocation8 + $0x20] sm:$0xff]   ;;  %v1296_v54 = vld [vmem:[#allocation8 + $0x68] sm:$0xff]   ;;  %v1300_v58 = vld [vmem:[#allocation8 + $0x70] sm:$0xff]  }
  0x57   :  { %299 = vmatpush1.bf16.msra.mxu0 %v1097_v28  ;;  %340 = vmatpush1.bf16.msra.mxu1 %v1099_v29  ;;  %v1295_v53 = vld [vmem:[#allocation8 + $0xa0] sm:$0xff]   ;;  %v1297_v55 = vld [vmem:[#allocation8 + $0xe8] sm:$0xff]   ;;  %v1301_v59 = vld [vmem:[#allocation8 + $0xf0] sm:$0xff]   ;;  %v122_v28 = vsub.s32 7, %v1550_v5 }
  0x58   :  { %300 = vmatprep.subr.bf16.mxu0 %v1106_v30  ;;  %341 = vmatprep.subr.bf16.mxu1 %v1108_v31  ;;  %v1298_v56 = vld [vmem:[#allocation8 + $0x28] sm:$0xff]   ;;  %v1302_v60 = vld [vmem:[#allocation8 + $0x30] sm:$0xff]   ;;  %v1304_v62 = vld [vmem:[#allocation8 + $0x78] sm:$0xff]  }
  0x59   :  { %330 = vmatprep.mubr.bf16.mxu0 %v1466_v0  ;;  %371 = vmatprep.mubr.bf16.mxu1 %v1466_v0  ;;  %v1299_v57 = vld [vmem:[#allocation8 + $0xa8] sm:$0xff]   ;;  %v1303_v61 = vld [vmem:[#allocation8 + $0xb0] sm:$0xff]   ;;  %v1305_v63 = vld [vmem:[#allocation8 + $0xf8] sm:$0xff]  }
  0x5a   :  { %v1306_v0 = vld [vmem:[#allocation8 + $0x38] sm:$0xff]   ;;  %v1308_v2 = vld [vmem:[#allocation8 + $0x140] sm:$0xff]  }
  0x5b   :  { %301 = vmatpush1.bf16.msra.mxu0 %v1105_v32  ;;  %342 = vmatpush1.bf16.msra.mxu1 %v1107_v33  ;;  %v1307_v1 = vld [vmem:[#allocation8 + $0xb8] sm:$0xff]   ;;  %v1309_v3 = vld [vmem:[#allocation8 + $0x1c0] sm:$0xff]  }
  0x5c   :  { %1178 = vmatprep.subr.bf16.mxu0 %v1276_v34  ;;  %1200 = vmatprep.subr.bf16.mxu1 %v1277_v35  ;;  %v1553_v7 = vld [vmem:[#allocation7] sm:$0xff]  ;;  %v1310_v35 = vld [vmem:[#allocation8 + $0x100] sm:$0xff]  }
  0x5d   :  { %v95_v11 = vrot.slane %v1553_v7, %v94_v6  ;;  %v103_v12 = vrot.slane %v1553_v7, %v102_v8  ;;  %v99_v13 = vrot.slane %v1553_v7, %v98_v9  ;;  %v107_v14 = vrot.slane %v1553_v7, %v106_v10  ;;  %v1325_v4 = vld [vmem:[#allocation8 + $0x1e0] sm:$0xff]  }
  0x5e   :  { %1111 = vmatmul.mubr.msk.bf16.vlgmr.msra.gmra.mrb[4].mxu0 %vm212_vm0, %v73_v27  ;;  %1112 = vmatmul.mubr.msk.bf16.vlgmr.msra.gmra.mrb[4].mxu1 %vm212_vm0, %v73_v27  ;;  %v1326_v6 = vld [vmem:[#allocation8 + $0x120] sm:$0xff]   ;;  %v118_v8 = vsub.s32 6, %v1550_v5  ;;  %v110_v10 = vsub.s32 4, %v1550_v5 }
  0x5f   :  { %1179 = vmatpush3.bf16.msra.mxu0 %v1278_v36  ;;  %1201 = vmatpush3.bf16.msra.mxu1 %v1279_v37  ;;  %v115_v36 = vrot.slane %v1553_v7, %v114_v23  ;;  %v1327_v9 = vld [vmem:[#allocation8 + $0x1a0] sm:$0xff]   ;;  %v1337_v23 = vld [vmem:[#allocation8 + $0x1f8] sm:$0xff]  }
  0x60   :  { %1180 = vmatprep.subr.bf16.mxu0 %v1280_v38  ;;  %1202 = vmatprep.subr.bf16.mxu1 %v1281_v39  ;;  %v1311_v39 = vld [vmem:[#allocation8 + $0x180] sm:$0xff]  }
  0x63   :  { %1181 = vmatpush3.bf16.msra.mxu0 %v1282_v40  ;;  %1203 = vmatpush3.bf16.msra.mxu1 %v1283_v41  ;;  %v1312_v40 = vld [vmem:[#allocation8 + $0x148] sm:$0xff]   ;;  %v123_v41 = vrot.slane %v1553_v7, %v122_v28 }
  0x64   :  { %1182 = vmatprep.subr.bf16.mxu0 %v1284_v42  ;;  %1204 = vmatprep.subr.bf16.mxu1 %v1285_v43  ;;  %v1313_v42 = vld [vmem:[#allocation8 + $0x1c8] sm:$0xff]  }
  0x67   :  { %1183 = vmatpush3.bf16.msra.mxu0 %v1286_v44  ;;  %1205 = vmatpush3.bf16.msra.mxu1 %v1287_v45 }
  0x68   :  { %1184 = vmatprep.subr.bf16.mxu0 %v1288_v46  ;;  %1206 = vmatprep.subr.bf16.mxu1 %v1289_v47  ;;  %v1314_v46 = vld [vmem:[#allocation8 + $0x108] sm:$0xff]  }
  0x6b   :  { %1185 = vmatpush3.bf16.msra.mxu0 %v1290_v48  ;;  %1207 = vmatpush3.bf16.msra.mxu1 %v1291_v49 }
  0x6c   :  { %1186 = vmatprep.subr.bf16.mxu0 %v1292_v50  ;;  %1208 = vmatprep.subr.bf16.mxu1 %v1293_v51  ;;  %v1315_v50 = vld [vmem:[#allocation8 + $0x188] sm:$0xff]   ;;  %v1316_v51 = vld [vmem:[#allocation8 + $0x150] sm:$0xff]  }
  0x6f   :  { %1187 = vmatpush3.bf16.msra.mxu0 %v1294_v52  ;;  %1209 = vmatpush3.bf16.msra.mxu1 %v1295_v53 }
  0x70   :  { %1188 = vmatprep.subr.bf16.mxu0 %v1296_v54  ;;  %1210 = vmatprep.subr.bf16.mxu1 %v1297_v55  ;;  %v1317_v55 = vld [vmem:[#allocation8 + $0x1d0] sm:$0xff]  }
  0x73   :  { %1189 = vmatpush3.bf16.msra.mxu0 %v1298_v56  ;;  %1211 = vmatpush3.bf16.msra.mxu1 %v1299_v57 }
  0x74   :  { %1190 = vmatprep.subr.bf16.mxu0 %v1300_v58  ;;  %1212 = vmatprep.subr.bf16.mxu1 %v1301_v59  ;;  %v1318_v59 = vld [vmem:[#allocation8 + $0x110] sm:$0xff]  }
  0x77   :  { %1191 = vmatpush3.bf16.msra.mxu0 %v1302_v60  ;;  %1213 = vmatpush3.bf16.msra.mxu1 %v1303_v61  ;;  %v1319_v61 = vld [vmem:[#allocation8 + $0x190] sm:$0xff]  }
  0x78   :  { %1192 = vmatprep.subr.bf16.mxu0 %v1304_v62  ;;  %1214 = vmatprep.subr.bf16.mxu1 %v1305_v63  ;;  %v1320_v62 = vld [vmem:[#allocation8 + $0x158] sm:$0xff]  }
  0x7b   :  { %1193 = vmatpush3.bf16.msra.mxu0 %v1306_v0  ;;  %1215 = vmatpush3.bf16.msra.mxu1 %v1307_v1  ;;  %v1321_v0 = vld [vmem:[#allocation8 + $0x1d8] sm:$0xff]  }
  0x7c   :  { %1222 = vmatprep.subr.bf16.mxu0 %v1308_v2  ;;  %1244 = vmatprep.subr.bf16.mxu1 %v1309_v3  ;;  %v1322_v1 = vld [vmem:[#allocation8 + $0x118] sm:$0xff]   ;;  %v1324_v3 = vld [vmem:[#allocation8 + $0x160] sm:$0xff]  }
  0x7d   :  { %v1323_v2 = vld [vmem:[#allocation8 + $0x198] sm:$0xff]  }
 0x129   :  { %v250_v15 = vpop.f32.mrb[0].mxu0  ;;  %v291_v17 = vpop.f32.mrb[0].mxu1 }
 0x12a   :  { %v251_v16 = vadd.f32 %v250_v15, %v95_v11  ;;  %v252_v18 = vpop.f32.mrb[1].mxu0  ;;  %v292_v19 = vadd.f32 %v291_v17, %v103_v12  ;;  %v293_v21 = vpop.f32.mrb[1].mxu1  ;;  %v1328_v11 = vld [vmem:[#allocation8 + $0x168] sm:$0xff]   ;;  %v111_v15 = vrot.slane %v1553_v7, %v110_v10  ;;  %v1332_v17 = vld [vmem:[#allocation8 + $0x170] sm:$0xff]  }
 0x12b   :  { %v253_v20 = vadd.f32 %v252_v18, %v99_v13  ;;  %v254_v22 = vpop.f32.mrb[2].mxu0  ;;  %v294_v25 = vadd.f32 %v293_v21, %v107_v14  ;;  %v295_v26 = vpop.f32.mrb[2].mxu1  ;;  %v1329_v12 = vld [vmem:[#allocation8 + $0x1e8] sm:$0xff]   ;;  %v119_v14 = vrot.slane %v1553_v7, %v118_v8  ;;  %v1333_v18 = vld [vmem:[#allocation8 + $0x1f0] sm:$0xff]  }
 0x12c   :  { %v380_v24 = vmax.f32 %v251_v16, 0.0  ;;  %v255_v27 = vpop.f32.mrb[3].mxu0  ;;  %v382_v29 = vmax.f32 %v292_v19, 0.0  ;;  %v296_v31 = vpop.f32.mrb[3].mxu1  ;;  %v1330_v13 = vld [vmem:[#allocation8 + $0x128] sm:$0xff]   ;;  %v1335_v21 = vld [vmem:[#allocation8 + $0x1b0] sm:$0xff]  }
 0x12d   :  { %v381_v30 = vmax.f32 %v253_v20, 0.0  ;;  %v383_v32 = vmax.f32 %v294_v25, 0.0  ;;  %v1331_v16 = vld [vmem:[#allocation8 + $0x1a8] sm:$0xff]   ;;  %v1334_v20 = vld [vmem:[#allocation8 + $0x130] sm:$0xff]   ;;  %v1336_v22 = vld [vmem:[#allocation8 + $0x178] sm:$0xff]  }
 0x12e   :  { %v390_v33 = vpack.c.bf16 %v382_v29, %v382_v29  ;;  %v388_v37 = vpack.c.bf16 %v380_v24, %v380_v24  ;;  %v1338_v25 = vld [vmem:[#allocation8 + $0x138] sm:$0xff]   ;;  %v1113_v31 = vld [vmem:[%s1592_s4] ss:$0 sm:$0xff]  ;;  %s1467_s4 = smov [#allocation10]  }
 0x12f   :  { %v389_v34 = vpack.c.bf16 %v381_v30, %v381_v30  ;;  %v391_v38 = vpack.c.bf16 %v383_v32, %v383_v32  ;;  %v1339_v26 = vld [vmem:[#allocation8 + $0x1b8] sm:$0xff]   ;;  %s1082_s1 = sshll.u32 %s1467_s4, 4  ;;  %s1083_s1 = int_to_ptr.vmem [resolvable:$true] %s1082_s1 }
 0x130   :  { %s1428_s18 = scalar_lea.vmem %s1083_s1, 128  ;;  %p1433_p5 = scmp.lt.s32.totalorder %s1083_s1, %s1083_s1 }
 0x131   :  { %947 = vmatprep.mubr.bf16.mxu0 %v389_v34  ;;  %v1566_v43 = vpop.f32.mrb[4].mxu0  ;;  %987 = vmatprep.mubr.bf16.mxu1 %v391_v38  ;;  %v373_v45 = vpop.f32.mrb[4].mxu1  ;;  %p1429_p4 = scmp.ne.s32.totalorder %s1083_s1, %s1428_s18  ;;  %p1434_p6 = scmp.lt.s32.totalorder %s1428_s18, %s1428_s18 }
 0x132   :  { %948 = vmatmul.mubr.bf16.vlgmr.msra.gmra.mrb[8].mxu0 %v388_v37  ;;  %v334_v44 = vpop.f32.mrb[5].mxu0  ;;  %988 = vmatmul.mubr.bf16.vlgmr.msra.gmra.mrb[8].mxu1 %v390_v33  ;;  %v375_v49 = vpop.f32.mrb[5].mxu1  ;;  %v374_v19 = vadd.f32 %v373_v45, %v119_v14  ;;  %v333_v5 = vadd.f32 %v1566_v43, %v111_v15 }
 0x133   :  { %1223 = vmatpush3.bf16.msra.mxu0 %v1310_v35  ;;  %v335_v47 = vadd.f32 %v334_v44, %v115_v36  ;;  %v336_v48 = vpop.f32.mrb[6].mxu0  ;;  %1245 = vmatpush3.bf16.msra.mxu1 %v1311_v39  ;;  %v376_v53 = vadd.f32 %v375_v49, %v123_v41  ;;  %v377_v54 = vpop.f32.mrb[6].mxu1  ;;  %p1435_p7 = por %p1434_p6, %p1433_p5 }
 0x134   :  { %1224 = vmatprep.subr.bf16.mxu0 %v1312_v40  ;;  %v337_v52 = vpop.f32.mrb[7].mxu0  ;;  %1246 = vmatprep.subr.bf16.mxu1 %v1313_v42  ;;  %v378_v57 = vpop.f32.mrb[7].mxu1  ;;  %v386_v24 = vmax.f32 %v374_v19, 0.0  ;;  %v384_v7 = vmax.f32 %v333_v5, 0.0 }
 0x135   :  { %v385_v56 = vmax.f32 %v335_v47, 0.0  ;;  %v387_v58 = vmax.f32 %v376_v53, 0.0  ;;  %p1436_p8 = pnand %p1435_p7, %p1429_p4 }
 0x136   :  { %v394_v27 = vpack.c.bf16 %v386_v24, %v386_v24  ;;  %v392_v28 = vpack.c.bf16 %v384_v7, %v384_v7 }
 0x137   :  { %1225 = vmatpush3.bf16.msra.mxu0 %v1314_v46  ;;  %v393_v60 = vpack.c.bf16 %v385_v56, %v385_v56  ;;  %1247 = vmatpush3.bf16.msra.mxu1 %v1315_v50  ;;  %v395_v63 = vpack.c.bf16 %v387_v58, %v387_v58 }
 0x138   :  { %1226 = vmatprep.subr.bf16.mxu0 %v1316_v51  ;;  %1248 = vmatprep.subr.bf16.mxu1 %v1317_v55 }
 0x139   :  { %1027 = vmatprep.mubr.bf16.mxu0 %v393_v60  ;;  %1067 = vmatprep.mubr.bf16.mxu1 %v395_v63 }
 0x13b   :  { %1227 = vmatpush3.bf16.msra.mxu0 %v1318_v59  ;;  %1249 = vmatpush3.bf16.msra.mxu1 %v1319_v61 }
 0x13c   :  { %1228 = vmatprep.subr.bf16.mxu0 %v1320_v62  ;;  %1250 = vmatprep.subr.bf16.mxu1 %v1321_v0 }
 0x13f   :  { %1229 = vmatpush3.bf16.msra.mxu0 %v1322_v1  ;;  %1251 = vmatpush3.bf16.msra.mxu1 %v1323_v2 }
 0x140   :  { %1230 = vmatprep.subr.bf16.mxu0 %v1324_v3  ;;  %1252 = vmatprep.subr.bf16.mxu1 %v1325_v4 }
 0x143   :  { %1231 = vmatpush3.bf16.msra.mxu0 %v1326_v6  ;;  %1253 = vmatpush3.bf16.msra.mxu1 %v1327_v9 }
 0x144   :  { %1232 = vmatprep.subr.bf16.mxu0 %v1328_v11  ;;  %1254 = vmatprep.subr.bf16.mxu1 %v1329_v12 }
 0x147   :  { %1233 = vmatpush3.bf16.msra.mxu0 %v1330_v13  ;;  %1255 = vmatpush3.bf16.msra.mxu1 %v1331_v16 }
 0x148   :  { %1234 = vmatprep.subr.bf16.mxu0 %v1332_v17  ;;  %1256 = vmatprep.subr.bf16.mxu1 %v1333_v18 }
 0x14b   :  { %1235 = vmatpush3.bf16.msra.mxu0 %v1334_v20  ;;  %1257 = vmatpush3.bf16.msra.mxu1 %v1335_v21 }
 0x14c   :  { %1236 = vmatprep.subr.bf16.mxu0 %v1336_v22  ;;  %1258 = vmatprep.subr.bf16.mxu1 %v1337_v23 }
 0x14f   :  { %1237 = vmatpush3.bf16.msra.mxu0 %v1338_v25  ;;  %1259 = vmatpush3.bf16.msra.mxu1 %v1339_v26 }
 0x152   :  { %1028 = vmatmul.mubr.bf16.vlgmr.msra.gmra.mrb[12].mxu0 %v392_v28  ;;  %1068 = vmatmul.mubr.bf16.vlgmr.msra.gmra.mrb[12].mxu1 %v394_v27 }
 0x205   :  { %v1194_v29 = vpop.f32.mrb[8].mxu0  ;;  %v1216_v30 = vpop.f32.mrb[8].mxu1 }
 0x206   :  { %v1195_v32 = vpop.f32.mrb[9].mxu0  ;;  %v1217_v34 = vpop.f32.mrb[9].mxu1 }
 0x207   :  { %v1196_v33 = vadd.f32 %v1195_v32, %v1194_v29  ;;  %v1197_v35 = vpop.f32.mrb[10].mxu0  ;;  %v1218_v36 = vadd.f32 %v1217_v34, %v1216_v30  ;;  %v1219_v37 = vpop.f32.mrb[10].mxu1 }
 0x208   :  { %v1198_v38 = vpop.f32.mrb[11].mxu0  ;;  %v1220_v40 = vpop.f32.mrb[11].mxu1 }
 0x209   :  { %v950_v39 = vadd.f32 %v1196_v33, %v1113_v31 }
 0x20b   :  { %v990_v41 = vadd.f32 %v1218_v36, %v950_v39 }
 0x225   :  { %v1238_v42 = vpop.f32.mrb[12].mxu0  ;;  %v1260_v43 = vpop.f32.mrb[12].mxu1 }
 0x226   :  { %v1239_v44 = vpop.f32.mrb[13].mxu0  ;;  %v1261_v46 = vpop.f32.mrb[13].mxu1 }
 0x227   :  { %v1240_v45 = vadd.f32 %v1239_v44, %v1238_v42  ;;  %v1241_v47 = vpop.f32.mrb[14].mxu0  ;;  %v1262_v48 = vadd.f32 %v1261_v46, %v1260_v43  ;;  %v1263_v49 = vpop.f32.mrb[14].mxu1 }
 0x228   :  { %v1242_v50 = vpop.f32.mrb[15].mxu0  ;;  %v1264_v52 = vpop.f32.mrb[15].mxu1 }
 0x229   :  { %v1030_v51 = vadd.f32 %v1240_v45, %v990_v41 }
 0x22b   :  { %v1070_v53 = vadd.f32 %v1262_v48, %v1030_v51 }
 0x22d   :  { %1075 = vst [vmem:[#allocation10] sm:$0xff] %v1070_v53 }
 0x22e   :  { %1439 = shalt.err (!%p1436_p8)
}
 0x22f   :  { %s1440_s21 = scalar_lea.hbm %s1593_s5, 128 }
 0x230   :  { %p1441_p9 = scmp.ne.s32.totalorder %s1593_s5, %s1440_s21  ;;  %p1444_p10 = scmp.lt.u32.totalorder %s1440_s21, %s1593_s5 }
 0x232   :  { %p1446_p11 = pnand %p1444_p10, %p1441_p9 }
 0x234   :  { %1449 = shalt.err (!%p1446_p11)
}
 0x235   :  { %1085 = dma.vmem_to_hbm [thread:$0]  %s1083_s1, 128, %s1593_s5, [#allocation4]  }
 0x236   :  { %1456 = dma.done.wait [#allocation4], 128  }
 0x237   :  { %1457 = vsyncadd [#allocation4], 4294967168 }
 0x238   :  { %1089 = vsyncpa [#allocation3], 1 }
 0x239   :  { %1090 = vsyncpa [#allocation6], 1 }
 0x23a   :  { %1091 = vsyncpa [#allocation9], 1 }
 0x23b   :  { %1092 = vsyncpa [#allocation4], 1 }

</bundles_post_ra>
